<compile_context>
chip_gen: v7x
topology: tpu7x:2x2x1
jax: 0.10.0
libtpu: 0.0.40
codegen_flags: <defaults>
</compile_context>

<pallas_src>
import functools

import jax
import jax.numpy as jnp
import numpy as np
from jax import lax
from jax.experimental import pallas as pl
from jax.experimental.pallas import tpu as pltpu

_LANES = 128
_SUBLANES = 8
_TILE_BUDGET_BYTES = 4 * 1024 * 1024   # per logits pipeline buffer
_VMEM_LIMIT_BYTES = 32 * 1024 * 1024   # fits v5e/v6e/v7x (worst case ~17 MiB)


def _pc_ce_kernel_rows(logits_ref, label_ref, w_ref, cls_ref, loss_ref,
                       cnt_ref, *, ignore_index, r_total, tile_rows, acc_rows):
    """Dense path: spatial viewed as (rows, 128); class axis leading.

    logits_ref: (1, C, TR, 128)   input dtype
    label_ref : (1, 1, TR, 128)   int32
    w_ref     : (C, 1, 1)         f32 class prior (resident)
    cls_ref   : (C, 1, 1)         int32 class indices (resident)
    loss_ref  : (1, acc_rows, 128) f32 per-batch partial loss (resident)
    cnt_ref   : (1, acc_rows, 128) f32 per-batch partial valid count
    """
    s = pl.program_id(1)

    @pl.when(s == 0)
    def _():
        loss_ref[...] = jnp.zeros_like(loss_ref)
        cnt_ref[...] = jnp.zeros_like(cnt_ref)

    x = logits_ref[0]                       # (C, TR, 128), input dtype
    lab = label_ref[0][0]                   # (TR, 128) int32
    w = w_ref[...]                          # (C, 1, 1) f32
    cls = cls_ref[...]                      # (C, 1, 1) int32

    # Validity: drop ignore_index and the ragged tail of the last row tile
    # (no HBM pad of logits or labels).
    row = s * tile_rows + lax.broadcasted_iota(jnp.int32, lab.shape, 0)
    valid = jnp.logical_and(lab != ignore_index, row < r_total)
    lab_c = jnp.where(valid, lab, 0)

    # Numerically stable, class-prior-compensated softmax pieces.  Class
    # reductions are over the LEADING axis -> pure VPU elementwise work,
    # dense vregs for any C.  max/sub/select stay in the input dtype
    # (bf16-friendly on v6e/v7x); exp/log/accumulation are f32.
    m = jnp.max(x, axis=0, keepdims=True)                      # (1, TR, 128)
    z = x - m                                                  # (C, TR, 128)
    expz = jnp.exp(z.astype(jnp.float32))
    exp_wsum = jnp.sum(expz * w, axis=0)                       # (TR, 128) f32

    z_at_lab = jnp.sum(
        jnp.where(cls == lab_c[None], z, jnp.zeros_like(z)).astype(jnp.float32),
        axis=0)                                                # (TR, 128) f32

    per_pos = jnp.where(valid, jnp.log(exp_wsum) - z_at_lab, 0.0)
    vcnt = valid.astype(jnp.float32)

    # Fold the tile into the resident (acc_rows, 128) per-batch partials
    # (pure VPU adds; single tiny XLA reduce happens in the wrapper).
    loss_ref[...] += per_pos.reshape(-1, acc_rows, _LANES).sum(axis=0)[None]
    cnt_ref[...] += vcnt.reshape(-1, acc_rows, _LANES).sum(axis=0)[None]


def _pc_ce_kernel_lanes(logits_ref, label_ref, w_ref, cls_ref, loss_ref,
                        cnt_ref, *, ignore_index, s_total, tile_s):
    """Ragged-S fallback: classes on sublanes, positions on lanes.

    logits_ref: (1, C, TS); label_ref: (1, 1, TS)
    w_ref: (C, 1) f32; cls_ref: (C, 1) int32
    loss_ref / cnt_ref: (1, 1, TS) per-batch partials (resident across s).
    """
    s = pl.program_id(1)

    @pl.when(s == 0)
    def _():
        loss_ref[...] = jnp.zeros_like(loss_ref)
        cnt_ref[...] = jnp.zeros_like(cnt_ref)

    x = logits_ref[0]                        # (C, TS)
    lab = label_ref[0]                       # (1, TS) int32
    w = w_ref[...]                           # (C, 1) f32
    cls = cls_ref[...]                       # (C, 1) int32

    # Position mask: ignore_index and positions beyond S (ragged last block).
    pos = s * tile_s + lax.broadcasted_iota(jnp.int32, lab.shape, 1)
    valid = jnp.logical_and(lab != ignore_index, pos < s_total)
    lab_c = jnp.where(valid, lab, 0)

    m = jnp.max(x, axis=0, keepdims=True)                      # (1, TS)
    z = x - m
    expz = jnp.exp(z.astype(jnp.float32))
    exp_wsum = jnp.sum(expz * w, axis=0, keepdims=True)        # (1, TS)

    z_at_lab = jnp.sum(
        jnp.where(cls == lab_c, z, jnp.zeros_like(z)).astype(jnp.float32),
        axis=0, keepdims=True)                                 # (1, TS)

    per_pos = jnp.where(valid, jnp.log(exp_wsum) - z_at_lab, 0.0)

    loss_ref[...] += per_pos[None]
    cnt_ref[...] += valid.astype(jnp.float32)[None]


def _choose_tile_rows(r_total, c, itemsize):
    rows = _TILE_BUDGET_BYTES // max(1, c * _LANES * itemsize)
    rows = max(_SUBLANES, (rows // _SUBLANES) * _SUBLANES)
    if rows >= r_total:
        return r_total                      # single spatial step, full extent
    return rows                             # multiple of 8


def _choose_tile_lanes(s_total, c, itemsize):
    t = _TILE_BUDGET_BYTES // max(1, c * itemsize)
    t = max(_LANES, (t // _LANES) * _LANES)
    if t >= s_total:
        return s_total                      # single spatial step, full extent
    return t                                # multiple of 128


def pc_softmax_cross_entropy(logits, label, lb_proportion, reduction='mean',
                             ignore_index=-100):
    """Forward of PCSoftmaxCrossEntropyV2.

    logits: (N, C, *spatial) float; label: (N, *spatial) int.
    Returns a scalar float32 loss (reduction in {'mean', 'sum'}).
    NOTE: if every position is ignored, n_valid == 0 and 'mean' yields NaN,
    matching the PyTorch op.
    """
    if reduction not in ('mean', 'sum'):
        # TODO(synk): reduction='none' (per-position output) not implemented.
        raise NotImplementedError(f"reduction={reduction!r} not supported")

    N, C = int(logits.shape[0]), int(logits.shape[1])
    S = 1
    for d in logits.shape[2:]:
        S *= int(d)

    # Free reshapes only: keep native NCHW order, no transpose / pad / upcast.
    x3 = logits.reshape(N, C, S)
    y3 = label.reshape(N, 1, S).astype(jnp.int32)
    w = jnp.asarray(lb_proportion, dtype=jnp.float32)
    cls_idx = jnp.arange(C, dtype=jnp.int32)
    itemsize = jnp.dtype(x3.dtype).itemsize

    if S % _LANES == 0:
        # Dense (rows, 128) path — free reshape, no HBM copy.
        r_total = S // _LANES
        x = x3.reshape(N, C, r_total, _LANES)
        y = y3.reshape(N, 1, r_total, _LANES)
        tile_rows = _choose_tile_rows(r_total, C, itemsize)
        acc_rows = _SUBLANES if tile_rows % _SUBLANES == 0 else tile_rows
        n_s = pl.cdiv(r_total, tile_rows)
        kernel = functools.partial(
            _pc_ce_kernel_rows, ignore_index=ignore_index, r_total=r_total,
            tile_rows=tile_rows, acc_rows=acc_rows)
        in_specs = [
            pl.BlockSpec((1, C, tile_rows, _LANES), lambda n, s: (n, 0, s, 0)),
            pl.BlockSpec((1, 1, tile_rows, _LANES), lambda n, s: (n, 0, s, 0)),
            pl.BlockSpec((C, 1, 1), lambda n, s: (0, 0, 0)),   # resident prior
            pl.BlockSpec((C, 1, 1), lambda n, s: (0, 0, 0)),   # resident cls idx
        ]
        out_block = (1, acc_rows, _LANES)
        args = (x, y, w.reshape(C, 1, 1), cls_idx.reshape(C, 1, 1))
    else:
        # Ragged-S fallback: (C, tile_s) blocks + in-kernel position mask.
        tile_s = _choose_tile_lanes(S, C, itemsize)
        n_s = pl.cdiv(S, tile_s)
        kernel = functools.partial(
            _pc_ce_kernel_lanes, ignore_index=ignore_index, s_total=S,
            tile_s=tile_s)
        in_specs = [
            pl.BlockSpec((1, C, tile_s), lambda n, s: (n, 0, s)),
            pl.BlockSpec((1, 1, tile_s), lambda n, s: (n, 0, s)),
            pl.BlockSpec((C, 1), lambda n, s: (0, 0)),
            pl.BlockSpec((C, 1), lambda n, s: (0, 0)),
        ]
        out_block = (1, 1, tile_s)
        args = (x3, y3, w.reshape(C, 1), cls_idx.reshape(C, 1))

    out_shape = (
        jax.ShapeDtypeStruct((N,) + out_block[1:], jnp.float32),  # loss partials
        jax.ShapeDtypeStruct((N,) + out_block[1:], jnp.float32),  # valid counts
    )
    out_specs = (
        pl.BlockSpec(out_block, lambda n, s: (n, 0, 0)),
        pl.BlockSpec(out_block, lambda n, s: (n, 0, 0)),
    )

    cost = pl.CostEstimate(
        flops=int(8 * N * S * C + 6 * N * S),
        transcendentals=int(N * S * (C + 1)),
        bytes_accessed=int(N * C * S * itemsize + N * S * 4 + 2 * C * 4),
    )

    loss_part, cnt_part = pl.pallas_call(
        kernel,
        out_shape=out_shape,
        grid_spec=pltpu.PrefetchScalarGridSpec(
            num_scalar_prefetch=0,
            grid=(N, n_s),
            in_specs=in_specs,
            out_specs=out_specs,
        ),
        compiler_params=pltpu.CompilerParams(
            dimension_semantics=("parallel", "arbitrary"),
            vmem_limit_bytes=_VMEM_LIMIT_BYTES),
        cost_estimate=cost,
    )(*args)

    loss_sum = jnp.sum(loss_part)
    n_valid = jnp.sum(cnt_part)
    if reduction == 'sum':
        return loss_sum
    return loss_sum / n_valid  # 'mean'


def _reference(logits, label, lb_proportion, reduction='mean',
               ignore_index=-100):
    # Pure-JAX reference mirroring the PyTorch forward.
    C = logits.shape[1]
    W = jnp.asarray(lb_proportion, jnp.float32).reshape(
        (1, C) + (1,) * (logits.ndim - 2))
    ignore = label == ignore_index
    n_valid = jnp.sum((~ignore).astype(jnp.float32))
    lab = jnp.where(ignore, 0, label)
    onehot = jax.nn.one_hot(lab, C, axis=1, dtype=jnp.float32)
    onehot = onehot * (~ignore)[:, None].astype(jnp.float32)
    x32 = logits.astype(jnp.float32)
    z = x32 - jnp.max(x32, axis=1, keepdims=True)
    exp_wsum = jnp.sum(jnp.exp(z) * W, axis=1, keepdims=True)
    log_wsoftmax = z - jnp.log(exp_wsum)
    loss = -jnp.sum(log_wsoftmax * onehot, axis=1)
    if reduction == 'sum':
        return jnp.sum(loss)
    return jnp.sum(loss) / n_valid


if __name__ == "__main__":
    key = jax.random.PRNGKey(0)
    k1, k2, k3, k4 = jax.random.split(key, 4)

    # Case 1: S = 16*16 = 256 (multiple of 128) -> dense (rows, 128) path.
    N, C, H, Wd = 2, 4, 16, 16
    logits = jax.random.normal(k1, (N, C, H, Wd), dtype=jnp.float32)
    label = jax.random.randint(k2, (N, H, Wd), 0, C, dtype=jnp.int32)
    label = label.at[0, 0, :5].set(-100)          # some ignored positions
    lb_prop = np.array([0.1, 0.2, 0.3, 0.4], dtype=np.float32)

    out = jax.block_until_ready(
        pc_softmax_cross_entropy(logits, label, lb_prop, reduction='mean'))
    ref = jax.block_until_ready(_reference(logits, label, lb_prop, 'mean'))
    np.testing.assert_allclose(np.asarray(out), np.asarray(ref),
                               rtol=1e-5, atol=1e-5)

    # Case 2: ragged spatial (S = 9*13 = 117, not a multiple of 128), odd C.
    N2, C2, H2, W2 = 2, 5, 9, 13
    logits2 = jax.random.normal(k3, (N2, C2, H2, W2), dtype=jnp.float32)
    label2 = jax.random.randint(k4, (N2, H2, W2), 0, C2, dtype=jnp.int32)
    label2 = label2.at[1, 2, :3].set(-100)
    lb_prop2 = np.linspace(0.05, 0.35, C2).astype(np.float32)

    for red in ('mean', 'sum'):
        out2 = jax.block_until_ready(
            pc_softmax_cross_entropy(logits2, label2, lb_prop2, reduction=red))
        ref2 = jax.block_until_ready(
            _reference(logits2, label2, lb_prop2, red))
        np.testing.assert_allclose(np.asarray(out2), np.asarray(ref2),
                                   rtol=1e-5, atol=1e-5)

    print("KERNEL_OK")
</pallas_src>

<mosaic_0001>
module attributes {stable_mosaic.version = 11 : i64} {
  func.func @_pc_ce_kernel_rows(%arg0: i32, %arg1: i32, %arg2: memref<1x4x2x128xf32, #tpu.memory_space<vmem>>, %arg3: memref<1x1x2x128xi32, #tpu.memory_space<vmem>>, %arg4: memref<4x1x1xf32, #tpu.memory_space<vmem>>, %arg5: memref<4x1x1xi32, #tpu.memory_space<vmem>>, %arg6: memref<1x2x128xf32, #tpu.memory_space<vmem>>, %arg7: memref<1x2x128xf32, #tpu.memory_space<vmem>>) attributes {dimension_semantics = [#tpu.dimension_semantics<parallel>, #tpu.dimension_semantics<arbitrary>], iteration_bounds = array<i64: 2, 1>, scalar_prefetch = 0 : i64, scratch_operands = 0 : i64, tpu.core_type = #tpu.core_type<tc>, window_params = [{transform_indices = @transform_0, window_bounds = array<i64: 1, 4, 2, 128>}, {transform_indices = @transform_1, window_bounds = array<i64: 1, 1, 2, 128>}, {pipeline_mode = #tpu.pipeline_mode<synchronous>, transform_indices = @transform_2, window_bounds = array<i64: 4, 1, 1>}, {pipeline_mode = #tpu.pipeline_mode<synchronous>, transform_indices = @transform_3, window_bounds = array<i64: 4, 1, 1>}, {transform_indices = @transform_4, window_bounds = array<i64: 1, 2, 128>}, {transform_indices = @transform_5, window_bounds = array<i64: 1, 2, 128>}]} {
    %c0_i32 = arith.constant 0 : i32
    %0 = arith.cmpi eq, %arg1, %c0_i32 : i32
    %1 = arith.extui %0 : i1 to i32
    %c0_i32_0 = arith.constant 0 : i32
    %2 = arith.cmpi ne, %1, %c0_i32_0 : i32
    scf.if %2 {
      %cst_34 = arith.constant 0.000000e+00 : f32
      %54 = vector.broadcast %cst_34 : f32 to vector<1x2x128xf32>
      %c0_35 = arith.constant 0 : index
      %c0_36 = arith.constant 0 : index
      %c0_37 = arith.constant 0 : index
      %55 = vector.load %arg6[%c0_35, %c0_36, %c0_37] : memref<1x2x128xf32, #tpu.memory_space<vmem>>, vector<1x2x128xf32>
      tpu.vector_store %arg6[%c0_35, %c0_36, %c0_37], %54 {strides = array<i32>} : memref<1x2x128xf32, #tpu.memory_space<vmem>>, vector<1x2x128xf32>,
      %cst_38 = arith.constant 0.000000e+00 : f32
      %56 = vector.broadcast %cst_38 : f32 to vector<1x2x128xf32>
      %c0_39 = arith.constant 0 : index
      %c0_40 = arith.constant 0 : index
      %c0_41 = arith.constant 0 : index
      %57 = vector.load %arg7[%c0_39, %c0_40, %c0_41] : memref<1x2x128xf32, #tpu.memory_space<vmem>>, vector<1x2x128xf32>
      tpu.vector_store %arg7[%c0_39, %c0_40, %c0_41], %56 {strides = array<i32>} : memref<1x2x128xf32, #tpu.memory_space<vmem>>, vector<1x2x128xf32>,
    } else {
    }
    %c0 = arith.constant 0 : index
    %c0_1 = arith.constant 0 : index
    %c0_2 = arith.constant 0 : index
    %c0_3 = arith.constant 0 : index
    %3 = vector.load %arg2[%c0, %c0_1, %c0_2, %c0_3] : memref<1x4x2x128xf32, #tpu.memory_space<vmem>>, vector<1x4x2x128xf32>
    %4 = vector.shape_cast %3 : vector<1x4x2x128xf32> to vector<4x2x128xf32>
    %c0_4 = arith.constant 0 : index
    %c0_5 = arith.constant 0 : index
    %c0_6 = arith.constant 0 : index
    %c0_7 = arith.constant 0 : index
    %5 = vector.load %arg3[%c0_4, %c0_5, %c0_6, %c0_7] : memref<1x1x2x128xi32, #tpu.memory_space<vmem>>, vector<1x1x2x128xi32>
    %6 = vector.shape_cast %5 : vector<1x1x2x128xi32> to vector<1x2x128xi32>
    %7 = vector.shape_cast %6 : vector<1x2x128xi32> to vector<2x128xi32>
    %c0_8 = arith.constant 0 : index
    %c0_9 = arith.constant 0 : index
    %c0_10 = arith.constant 0 : index
    %8 = vector.load %arg4[%c0_8, %c0_9, %c0_10] : memref<4x1x1xf32, #tpu.memory_space<vmem>>, vector<4x1x1xf32>
    %c0_11 = arith.constant 0 : index
    %c0_12 = arith.constant 0 : index
    %c0_13 = arith.constant 0 : index
    %9 = vector.load %arg5[%c0_11, %c0_12, %c0_13] : memref<4x1x1xi32, #tpu.memory_space<vmem>>, vector<4x1x1xi32>
    %c2_i32 = arith.constant 2 : i32
    %10 = arith.muli %arg1, %c2_i32 : i32
    %11 = tpu.iota {dimensions = array<i32: 0>} : vector<2x128xi32>
    %12 = vector.broadcast %10 : i32 to vector<2x128xi32>
    %13 = arith.addi %12, %11 : vector<2x128xi32>
    %c-100_i32 = arith.constant -100 : i32
    %14 = vector.broadcast %c-100_i32 : i32 to vector<2x128xi32>
    %15 = arith.cmpi ne, %7, %14 : vector<2x128xi32>
    %c2_i32_14 = arith.constant 2 : i32
    %16 = vector.broadcast %c2_i32_14 : i32 to vector<2x128xi32>
    %17 = arith.cmpi slt, %13, %16 : vector<2x128xi32>
    %18 = arith.andi %15, %17 : vector<2x128xi1>
    %c0_i32_15 = arith.constant 0 : i32
    %19 = vector.broadcast %c0_i32_15 : i32 to vector<2x128xi32>
    %20 = arith.select %18, %7, %19 : vector<2x128xi1>, vector<2x128xi32>
    %cst = arith.constant dense<0xFF800000> : vector<2x128xf32>
    %21 = vector.multi_reduction <maximumf>, %4, %cst [0] : vector<4x2x128xf32> to vector<2x128xf32>
    %22 = vector.shape_cast %21 : vector<2x128xf32> to vector<1x2x128xf32>
    %23 = vector.broadcast %22 : vector<1x2x128xf32> to vector<4x2x128xf32>
    %24 = arith.subf %4, %23 : vector<4x2x128xf32>
    %25 = math.exp %24 : vector<4x2x128xf32>
    %26 = vector.broadcast %8 : vector<4x1x1xf32> to vector<4x2x128xf32>
    %27 = arith.mulf %25, %26 : vector<4x2x128xf32>
    %cst_16 = arith.constant dense<0.000000e+00> : vector<2x128xf32>
    %28 = vector.multi_reduction <add>, %27, %cst_16 [0] : vector<4x2x128xf32> to vector<2x128xf32>
    %29 = vector.shape_cast %20 : vector<2x128xi32> to vector<1x2x128xi32>
    %30 = vector.broadcast %9 : vector<4x1x1xi32> to vector<4x2x128xi32>
    %31 = vector.broadcast %29 : vector<1x2x128xi32> to vector<4x2x128xi32>
    %32 = arith.cmpi eq, %30, %31 : vector<4x2x128xi32>
    %cst_17 = arith.constant 0.000000e+00 : f32
    %33 = vector.broadcast %cst_17 : f32 to vector<4x2x128xf32>
    %34 = arith.select %32, %24, %33 : vector<4x2x128xi1>, vector<4x2x128xf32>
    %cst_18 = arith.constant dense<0.000000e+00> : vector<2x128xf32>
    %35 = vector.multi_reduction <add>, %34, %cst_18 [0] : vector<4x2x128xf32> to vector<2x128xf32>
    %36 = math.log %28 : vector<2x128xf32>
    %37 = arith.subf %36, %35 : vector<2x128xf32>
    %cst_19 = arith.constant 0.000000e+00 : f32
    %38 = vector.broadcast %cst_19 : f32 to vector<2x128xf32>
    %39 = arith.select %18, %37, %38 : vector<2x128xi1>, vector<2x128xf32>
    %40 = arith.extui %18 : vector<2x128xi1> to vector<2x128xi32>
    %41 = arith.sitofp %40 : vector<2x128xi32> to vector<2x128xf32>
    %c0_20 = arith.constant 0 : index
    %c0_21 = arith.constant 0 : index
    %c0_22 = arith.constant 0 : index
    %42 = vector.load %arg6[%c0_20, %c0_21, %c0_22] : memref<1x2x128xf32, #tpu.memory_space<vmem>>, vector<1x2x128xf32>
    %43 = vector.shape_cast %39 : vector<2x128xf32> to vector<1x2x128xf32>
    %cst_23 = arith.constant dense<0.000000e+00> : vector<2x128xf32>
    %44 = vector.multi_reduction <add>, %43, %cst_23 [0] : vector<1x2x128xf32> to vector<2x128xf32>
    %45 = vector.shape_cast %44 : vector<2x128xf32> to vector<1x2x128xf32>
    %46 = arith.addf %42, %45 : vector<1x2x128xf32>
    %c0_24 = arith.constant 0 : index
    %c0_25 = arith.constant 0 : index
    %c0_26 = arith.constant 0 : index
    %47 = vector.load %arg6[%c0_24, %c0_25, %c0_26] : memref<1x2x128xf32, #tpu.memory_space<vmem>>, vector<1x2x128xf32>
    tpu.vector_store %arg6[%c0_24, %c0_25, %c0_26], %46 {strides = array<i32>} : memref<1x2x128xf32, #tpu.memory_space<vmem>>, vector<1x2x128xf32>,
    %c0_27 = arith.constant 0 : index
    %c0_28 = arith.constant 0 : index
    %c0_29 = arith.constant 0 : index
    %48 = vector.load %arg7[%c0_27, %c0_28, %c0_29] : memref<1x2x128xf32, #tpu.memory_space<vmem>>, vector<1x2x128xf32>
    %49 = vector.shape_cast %41 : vector<2x128xf32> to vector<1x2x128xf32>
    %cst_30 = arith.constant dense<0.000000e+00> : vector<2x128xf32>
    %50 = vector.multi_reduction <add>, %49, %cst_30 [0] : vector<1x2x128xf32> to vector<2x128xf32>
    %51 = vector.shape_cast %50 : vector<2x128xf32> to vector<1x2x128xf32>
    %52 = arith.addf %48, %51 : vector<1x2x128xf32>
    %c0_31 = arith.constant 0 : index
    %c0_32 = arith.constant 0 : index
    %c0_33 = arith.constant 0 : index
    %53 = vector.load %arg7[%c0_31, %c0_32, %c0_33] : memref<1x2x128xf32, #tpu.memory_space<vmem>>, vector<1x2x128xf32>
    tpu.vector_store %arg7[%c0_31, %c0_32, %c0_33], %52 {strides = array<i32>} : memref<1x2x128xf32, #tpu.memory_space<vmem>>, vector<1x2x128xf32>,
    return
  }
  func.func @transform_0(%arg0: i32, %arg1: i32) -> (i32, i32, i32, i32) {
    %c0_i32 = arith.constant 0 : i32
    %c0_i32_0 = arith.constant 0 : i32
    %c0_i32_1 = arith.constant 0 : i32
    return %arg0, %c0_i32, %arg1, %c0_i32_0 : i32, i32, i32, i32
  }
  func.func @transform_1(%arg0: i32, %arg1: i32) -> (i32, i32, i32, i32) {
    %c0_i32 = arith.constant 0 : i32
    %c0_i32_0 = arith.constant 0 : i32
    %c0_i32_1 = arith.constant 0 : i32
    return %arg0, %c0_i32, %arg1, %c0_i32_0 : i32, i32, i32, i32
  }
  func.func @transform_2(%arg0: i32, %arg1: i32) -> (i32, i32, i32) {
    %c0_i32 = arith.constant 0 : i32
    %c0_i32_0 = arith.constant 0 : i32
    %c0_i32_1 = arith.constant 0 : i32
    %c0_i32_2 = arith.constant 0 : i32
    return %c0_i32, %c0_i32_0, %c0_i32_1 : i32, i32, i32
  }
  func.func @transform_3(%arg0: i32, %arg1: i32) -> (i32, i32, i32) {
    %c0_i32 = arith.constant 0 : i32
    %c0_i32_0 = arith.constant 0 : i32
    %c0_i32_1 = arith.constant 0 : i32
    %c0_i32_2 = arith.constant 0 : i32
    return %c0_i32, %c0_i32_0, %c0_i32_1 : i32, i32, i32
  }
  func.func @transform_4(%arg0: i32, %arg1: i32) -> (i32, i32, i32) {
    %c0_i32 = arith.constant 0 : i32
    %c0_i32_0 = arith.constant 0 : i32
    %c0_i32_1 = arith.constant 0 : i32
    return %arg0, %c0_i32, %c0_i32_0 : i32, i32, i32
  }
  func.func @transform_5(%arg0: i32, %arg1: i32) -> (i32, i32, i32) {
    %c0_i32 = arith.constant 0 : i32
    %c0_i32_0 = arith.constant 0 : i32
    %c0_i32_1 = arith.constant 0 : i32
    return %arg0, %c0_i32, %c0_i32_0 : i32, i32, i32
  }
}

</mosaic_0001>

<bundles_post_ra>
// kernel: tpu_custom_call.1
= control target key start
LH: loop header
LB: loop body
LE: loop exit
PB: predicated region body
PF: predicated region fallthrough
CT: control target
= control target key end

     0   :  { %11 = vsyncpa [#allocation3], 0  ;;  %s1170_s0 = inlined_call_operand.hbm [shape: f32[2,4,2,128], index: 0, kind: input, shape index: {}]   ;;  %s1171_s1 = inlined_call_operand.vmem [shape: s32[2,1,2,128], index: 1, kind: input, shape index: {}]   ;;  %s1172_s2 = inlined_call_operand.vmem [shape: f32[4,1,1], index: 2, kind: input, shape index: {}]   ;;  %s1173_s3 = inlined_call_operand.vmem [shape: s32[4,1,1], index: 3, kind: input, shape index: {}]   ;;  %s1174_s4 = inlined_call_operand.hbm [shape: f32[2,2,128], index: 4, kind: output, shape index: {0}]   ;;  %s1175_s5 = inlined_call_operand.hbm [shape: f32[2,2,128], index: 5, kind: output, shape index: {1}]  }
   0x1   :  { %13 = vsyncpa [#allocation3 + $0x1], 0 }
   0x2   :  { %14 = vsyncpa [#allocation4], 0 }
   0x3   :  { %16 = vsyncpa [#allocation4 + $0x1], 0 }
   0x4   :  { %17 = vsyncpa [#allocation7], 0 }
   0x5   :  { %19 = vsyncpa [#allocation7 + $0x1], 0  ;;  %s902_s18 = smov 0   ;;  %s904_s19 = smov 0  }
   0x6   :  { %s906_s20 = smov 0   ;;  %s908_s21 = smov 0  }
   0x7   :  { %s910_s22 = smov 0   ;;  %s912_s23 = smov 0  }
   0x8 LB: > { %s608_s24 = sadd.s32 4294967295, %s863_s23   ;;  %s609_s25 = sadd.s32 4294967294, %s863_s23   ;;  %s863_s23 = sphi %s912_s23, %s25_s23   ;;  %s859_s22 = sphi %s910_s22, %s1192_s22   ;;  %s855_s21 = sphi %s908_s21, %s1191_s21   ;;  %s851_s20 = sphi %s906_s20, %s1190_s20   ;;  %s847_s19 = sphi %s904_s19, %s1189_s19   ;;  %s843_s18 = sphi %s902_s18, %s1188_s18  }
   0x9   : > { %s37_s26 = sadd.s32 1, %s859_s22  ;;  %s46_s27 = sadd.s32 1, %s851_s20 }
   0xa   : > { %p39_p0 = scmp.ge.s32.totalorder %s37_s26, 2  ;;  %p53_p1 = scmp.ne.s32.totalorder %s851_s20, %s847_s19 }
   0xb   : > { %p54_p2 = scmp.eq.s32.totalorder %s863_s23, 0  ;;  %p59_p3 = scmp.ne.s32.totalorder %s847_s19, %s843_s18 }
   0xc   : > { %s1194_s26 = smov (%p39_p0, %s37_s26), 0  ;;  %p60_p5 = scmp.eq.s32.totalorder %s608_s24, 0 }
   0xd   : > { %p943_p4 = por %p54_p2, %p53_p1  ;;  %s41_s29 = ssub.s32 %s859_s22, %s1194_s26 }
   0xe   : > { %p153_p6 = scmp.eq.s32.totalorder %s608_s24, 1  ;;  %p44_p7 = scmp.eq.s32.totalorder %s41_s29, 0 }
   0xf   : > { %p949_p8 = por %p60_p5, %p59_p3  ;;  %p159_p10 = scmp.eq.s32.totalorder %s609_s25, 1 }
  0x10   : > { %p953_p9 = por %p153_p6, %p53_p1  ;;  %p653_p13 = scmp.lt.s32.totalorder %s863_s23, 2 }
  0x11   : > { %s958_s7 = scalar_select %p44_p7, %s851_s20, %s46_s27  }
  0x12   : > { %s1179_s6 = scalar_select %p953_p9, 1, 0 }
  0x13   : > { %p960_p11 = por %p159_p10, %p59_p3  ;;  %s211_s9 = sand.u32 1, %s851_s20  }
  0x14   : > { %s612_s10 = sshll.u32 %s211_s9, 3  ;;  %s635_s11 = sshll.u32 %s859_s22, 7 }
  0x15   : > { %s1180_s8 = scalar_select %p960_p11, 1, 0 }
  0x16   : > { %s971_s14 = scalar_lea.hbm %s1170_s0, %s635_s11  ;;  %s215_s15 = scalar_lea.vmem [#allocation2], %s612_s10 }
  0x17   : > { %s223_s16 = sshll.u32 %s215_s15, 4  ;;  %p977_p0 = pnand %p653_p13, %p943_p4  ;;  %s973_s16 = int_to_ptr.vmem [resolvable:$true] %s223_s16 }
  0x18   : > { %s982_s24 = scalar_lea.sflag [#allocation3], %s211_s9  ;;  %s719_s25 = scalar_lea.hbm %s971_s14, 128 }
  0x19   : > { %p720_p2 = scmp.ne.s32.totalorder %s971_s14, %s719_s25  ;;  %p721_p3 = pneg %p977_p0 }
  0x1a   : > { %s724_s28 = scalar_lea.hbm %s1170_s0, 256  ;;  %p725_p4 = scmp.lt.u32.totalorder %s971_s14, %s1170_s0 }
  0x1b   : > { %p722_p5 = pnand %p721_p3, %p720_p2  ;;  %p726_p7 = scmp.lt.u32.totalorder %s724_s28, %s719_s25 }
  0x1c   : > { %p728_p13 = scmp.lt.u32.totalorder %s719_s25, %s971_s14 }
  0x1d   : > { %p723_p6 = pneg %p722_p5  ;;  %p727_p10 = por %p726_p7, %p725_p4 }
  0x1f   : > { %p729_p12 = por %p728_p13, %p727_p10 }
  0x21   : > { %p730_p1 = pnand %p729_p12, %p723_p6 }
  0x23   : > { %733 = shalt.err (!%p730_p1)
}
  0x24   : > { %s734_s9 = scalar_lea.vmem %s973_s16, 128  ;;  %s865_s12 = smov [#allocation2]  }
  0x25   : > { %p735_p2 = scmp.ne.s32.totalorder %s973_s16, %s734_s9  ;;  %s739_s13 = sshll.u32 %s865_s12, 4  ;;  %s740_s13 = int_to_ptr.vmem [resolvable:$false] %s739_s13 }
  0x26   : > { %s741_s15 = scalar_lea.vmem %s740_s13, 256  ;;  %p742_p9 = scmp.lt.s32.totalorder %s973_s16, %s740_s13 }
  0x27   : > { %p737_p5 = pnand %p735_p2, %p721_p3  ;;  %p743_p4 = scmp.lt.s32.totalorder %s741_s15, %s734_s9 }
  0x29   : > { %p738_p11 = pneg %p737_p5  ;;  %p744_p7 = por %p743_p4, %p742_p9 }
  0x2b   : > { %p745_p10 = pnand %p744_p7, %p738_p11 }
  0x2d   : > { %748 = shalt.err (!%p745_p10)
}
  0x2e   : > { %s866_s25 = smov 32   ;;  %s867_s27 = smov 2  }
  0x2f   : > { %645 = dma.hbm_to_vmem [thread:$0]  (!%p977_p0), %s971_s14, 128, %s973_s16, %s982_s24, %s866_s25, %s866_s25, %s867_s27  }
  0x30   : > { %p241_p12 = scmp.lt.s32.totalorder %s863_s23, 3  ;;  %p1182_p1 = scmp.ge.s32.totalorder %s863_s23, 1 }
  0x32   : > { %p242_p3 = pnand %p1182_p1, %p241_p12 }
  0x33   : > { %s1014_s29 = sand.u32 (!%p242_p3), 1, %s847_s19  }
  0x34   : > { %245 = sbr.rel (%p242_p3) target bundleno = 235 (0xeb), region = 36  ;;  %s616_s28 = sshll.u32 (!%p242_p3), %s1014_s29, 3 }
  0x35   : > { %s248_s10 = scalar_lea.sflag (!%p242_p3), [#allocation3], %s1014_s29  ;;  %s1018_s11 = scalar_lea.vmem (!%p242_p3), [#allocation2], %s616_s28 }
  0x3b   : > { %830 = dma.done.wait (%p949_p8), %s248_s10, 128  }
  0x3c   : > { %832 = vsyncadd (%p949_p8), %s248_s10, 4294967168  ;;  %v868_v0 = vmov 0   ;;  %v622_v1 = vld [vmem:[%s1172_s2 + $0x2] ss:$0 sm:$0xff]  ;;  %v620_v2 = vld [vmem:[%s1172_s2] ss:$0 sm:$0xff]  ;;  %v317_v7 = vlaneseq }
  0x3d   : > { %708 = vset.pattern.permute.xlu1 %v868_v0  ;;  %707 = vset.pattern.permute.xlu0 %v868_v0  ;;  %p290_p9 = scmp.lt.s32.totalorder %s855_s21, 1  ;;  %v623_v3 = vld [vmem:[%s1172_s2 + $0x3] ss:$0 sm:$0xff]  ;;  %v621_v4 = vld [vmem:[%s1172_s2 + $0x1] ss:$0 sm:$0xff]  ;;  %v869_v12 = vmov 0.0  }
  0x3e   : > { %374 = vperm.xlu1 %708, %v622_v1   ;;  %366 = vperm.xlu0 %707, %v620_v2   ;;  %v625_v5 = vld [vmem:[%s1173_s3 + $0x1] ss:$0 sm:$0xff]  ;;  %v624_v6 = vld [vmem:[%s1173_s3] ss:$0 sm:$0xff]  ;;  %v627_v8 = vld [vmem:[%s1173_s3 + $0x3] ss:$0 sm:$0xff] }
  0x3f   : > { %s291_s15 = scalar_select %p290_p9, %s855_s21, 1  ;;  %v626_v9 = vld [vmem:[%s1173_s3 + $0x2] ss:$0 sm:$0xff]  ;;  %v318_v10 = vshrl.u32 %v317_v7, 7 }
  0x40   : > { %s631_s28 = sshll.u32 %s855_s21, 5  ;;  %s455_s24 = scalar_lea.sflag [#allocation7], %s1014_s29 }
  0x41   : > { %s619_s14 = sshll.u32 %s291_s15, 1  ;;  %s617_s15 = sshll.u32 %s1014_s29, 1  ;;  %vm322_vm0 = vcmp.lt.s32.totalorder %v318_v10, 2 }
  0x42   : > { %378 = vperm.xlu1 %708, %v623_v3   ;;  %370 = vperm.xlu0 %707, %v621_v4   ;;  %s296_s13 = scalar_lea.vmem %s1171_s1, %s619_s14  ;;  %s289_s25 = scalar_lea.vmem [#allocation6], %s617_s15 }
  0x43   : > { %v1054_v11 = vld [vmem:[%s296_s13] sm:$0x3]  ;;  %302 = vst [vmem:[%s289_s25] sm:$0x3] %v869_v12  ;;  %s1063_s27 = scalar_lea.vmem [#allocation5], %s617_s15  ;;  %s1072_s16 = scalar_lea.hbm %s1175_s5, %s631_s28 }
  0x44   : > { %vm321_vm1 = vcmp.ne.s32.totalorder %v1054_v11, 4294967196  ;;  %301 = vst [vmem:[%s1063_s27] sm:$0x3] %v869_v12  ;;  %s481_s17 = sshll.u32 %s289_s25, 4  ;;  %p1185_p11 = scmp.ne.s32.totalorder %s1179_s6, 0  ;;  %s482_s17 = int_to_ptr.vmem [resolvable:$true] %s481_s17 }
  0x45   : > { %vm1057_vm2 = vmand %vm321_vm1, %vm322_vm0  ;;  %s749_s9 = scalar_lea.vmem %s482_s17, 32  ;;  %s870_s12 = smov [#allocation6]  }
  0x46   : > { %412 = vperm.xlu1 %708, %v625_v5   ;;  %409 = vperm.xlu0 %707, %v624_v6   ;;  %v628_v14 = vsel %vm1057_vm2, 1.0, %v869_v12  ;;  %p750_p8 = scmp.ne.s32.totalorder %s482_s17, %s749_s9  ;;  %s753_s30 = sshll.u32 %s870_s12, 4  ;;  %s754_s30 = int_to_ptr.vmem [resolvable:$false] %s753_s30 }
  0x47   : > { %s755_s13 = scalar_lea.vmem %s754_s30, 64  ;;  %p756_p13 = scmp.lt.s32.totalorder %s482_s17, %s754_s30 }
  0x48   : > { %p751_p0 = pnand %p750_p8, %p1185_p11  ;;  %p757_p2 = scmp.lt.s32.totalorder %s755_s13, %s749_s9 }
  0x4a   : > { %418 = vperm.xlu1 %708, %v627_v8   ;;  %415 = vperm.xlu0 %707, %v626_v9   ;;  %v445_v15 = vld [vmem:[%s289_s25] sm:$0x3]  ;;  %p752_p6 = pneg %p751_p0  ;;  %p758_p5 = por %p757_p2, %p756_p13 }
  0x4b   : > { %v447_v16 = vadd.f32 %v628_v14, %v445_v15 }
  0x4c   : > { %p759_p4 = pnand %p758_p5, %p752_p6 }
  0x4d   : > { %448 = vst [vmem:[%s289_s25] sm:$0x3] %v447_v16 }
  0x4e   : > { %762 = shalt.err (!%p759_p4)
}
  0x4f   : > { %s763_s15 = scalar_lea.hbm %s1072_s16, 32  ;;  %s767_s14 = scalar_lea.hbm %s1175_s5, 64 }
  0x50   : > { %p764_p7 = scmp.ne.s32.totalorder %s1072_s16, %s763_s15  ;;  %p768_p1 = scmp.lt.u32.totalorder %s1072_s16, %s1175_s5 }
  0x51   : > { %p769_p3 = scmp.lt.u32.totalorder %s767_s14, %s763_s15  ;;  %p771_p8 = scmp.lt.u32.totalorder %s763_s15, %s1072_s16 }
  0x52   : > { %p765_p10 = pnand %p764_p7, %p1185_p11 }
  0x53   : > { %p770_p9 = por %p769_p3, %p768_p1 }
  0x54   : > { %p766_p12 = pneg %p765_p10 }
  0x55   : > { %p772_p0 = por %p771_p8, %p770_p9 }
  0x57   : > { %p773_p6 = pnand %p772_p0, %p766_p12 }
  0x59   : > { %776 = shalt.err (!%p773_p6)
}
  0x5a   : > { %639 = dma.vmem_to_hbm [thread:$0]  (%p1185_p11), %s482_s17, 32, %s1072_s16, %s455_s24   ;;  %vm325_vm3 = vcmask 1041408   ;;  %v303_v17 = vld [vmem:[%s1018_s11] sm:$0x3]  ;;  %v304_v18 = vld [vmem:[%s1018_s11 + $0x2] sm:$0x3] }
  0x5b   : > { %v305_v19 = vld [vmem:[%s1018_s11 + $0x4] sm:$0x3]  ;;  %v306_v20 = vld [vmem:[%s1018_s11 + $0x6] sm:$0x3]  ;;  %v326_v21 = vsel %vm325_vm3, %v303_v17, -inf  ;;  %v327_v22 = vsel %vm325_vm3, %v304_v18, -inf  ;;  %s1120_s24 = scalar_lea.hbm %s1174_s4, %s631_s28 }
  0x5c   : > { %v328_v23 = vsel %vm325_vm3, %v305_v19, -inf  ;;  %v329_v24 = vsel %vm325_vm3, %v306_v20, -inf  ;;  %v330_v25 = vmax.f32 %v326_v21, %v327_v22  ;;  %v324_v50 = vsel %vm1057_vm2, %v1054_v11, 0  ;;  %v441_v10 = vld [vmem:[%s1063_s27] sm:$0x3]  ;;  %s468_s11 = sshll.u32 %s1063_s27, 4  ;;  %s1122_s11 = int_to_ptr.vmem [resolvable:$true] %s468_s11 }
  0x5d   : > { %v331_v26 = vmax.f32 %v328_v23, %v329_v24  ;;  %s450_s9 = scalar_lea.sflag [#allocation4], %s1014_s29  ;;  %s777_s13 = scalar_lea.vmem %s1122_s11, 32 }
  0x5e   : > { %p778_p13 = scmp.ne.s32.totalorder %s1122_s11, %s777_s13  ;;  %s871_s15 = smov [#allocation5]  }
  0x5f   : > { %v332_v27 = vmax.f32 %v330_v25, %v331_v26  ;;  %s781_s25 = sshll.u32 %s871_s15, 4  ;;  %s782_s25 = int_to_ptr.vmem [resolvable:$false] %s781_s25 }
  0x60   : > { %p779_p2 = pnand %p778_p13, %p1185_p11  ;;  %s783_s21 = scalar_lea.vmem %s782_s25, 64 }
  0x61   : > { %v333_v28 = vsub.f32 %v303_v17, %v332_v27  ;;  %v335_v29 = vsub.f32 %v305_v19, %v332_v27  ;;  %v334_v30 = vsub.f32 %v304_v18, %v332_v27  ;;  %v336_v32 = vsub.f32 %v306_v20, %v332_v27  ;;  %p784_p4 = scmp.lt.s32.totalorder %s1122_s11, %s782_s25  ;;  %p785_p7 = scmp.lt.s32.totalorder %s783_s21, %s777_s13 }
  0x62   : > { %p780_p5 = pneg %p779_p2 }
  0x63   : > { %v337_v31 = vmul.f32 1.442695, %v333_v28  ;;  %v341_v33 = vmul.f32 1.442695, %v335_v29  ;;  %v339_v34 = vmul.f32 1.442695, %v334_v30  ;;  %p786_p10 = por %p785_p7, %p784_p4 }
  0x64   : > { %v343_v35 = vmul.f32 1.442695, %v336_v32 }
  0x65   : > { %709 = vpow2.f32 %v337_v31  ;;  %p787_p12 = pnand %p786_p10, %p780_p5 }
  0x66   : > { %711 = vpow2.f32 %v341_v33 }
  0x67   : > { %713 = vpow2.f32 %v339_v34 }
  0x68   : > { %715 = vpow2.f32 %v343_v35 }
  0x6f   : > { %v710_v36 = vpop.eup %709 }
  0x70   : > { %v712_v39 = vpop.eup %711 }
  0x71   : > { %v714_v40 = vpop.eup %713 }
  0x72   : > { %v716_v42 = vpop.eup %715 }
  0xbd   : > { %v375_v37 = vpop.permute.xlu1 %374  ;;  %v367_v38 = vpop.permute.xlu0 %366 }
  0xbe   : > { %v381_v41 = vmul.f32 %v710_v36, %v367_v38  ;;  %v383_v45 = vmul.f32 %v712_v39, %v375_v37 }
  0xc0   : > { %v385_v47 = vsel %vm325_vm3, %v381_v41, 0.0  ;;  %v388_v54 = vsel %vm325_vm3, %v383_v45, 0.0 }
  0xc1   : > { %v379_v43 = vpop.permute.xlu1 %378  ;;  %v371_v44 = vpop.permute.xlu0 %370 }
  0xc2   : > { %v382_v46 = vmul.f32 %v714_v40, %v371_v44  ;;  %v384_v48 = vmul.f32 %v716_v42, %v379_v43 }
  0xc4   : > { %v386_v49 = vsel %vm325_vm3, %v382_v46, 0.0  ;;  %v390_v56 = vsel %vm325_vm3, %v384_v48, 0.0 }
  0xc5   : > { %v387_v51 = vadd.f32 %v386_v49, %v385_v47  ;;  %v413_v52 = vpop.permute.xlu1 %412  ;;  %v410_v53 = vpop.permute.xlu0 %409 }
  0xc6   : > { %vm421_vm4 = vcmp.eq.s32.totalorder %v413_v52, %v324_v50  ;;  %vm420_vm5 = vcmp.eq.s32.totalorder %v410_v53, %v324_v50 }
  0xc7   : > { %v389_v55 = vadd.f32 %v388_v54, %v387_v51  ;;  %v425_v59 = vsel %vm421_vm4, %v334_v30, 0.0  ;;  %v424_v60 = vsel %vm420_vm5, %v333_v28, 0.0 }
  0xc8   : > { %v429_v63 = vsel %vm325_vm3, %v425_v59, 0.0  ;;  %v428_v0 = vsel %vm325_vm3, %v424_v60, 0.0 }
  0xc9   : > { %v391_v57 = vadd.f32 %v390_v56, %v389_v55  ;;  %v416_v58 = vpop.permute.xlu0 %415  ;;  %v419_v61 = vpop.permute.xlu1 %418  ;;  %v430_v2 = vadd.f32 %v429_v63, %v428_v0 }
  0xca   : > { %vm422_vm6 = vcmp.eq.s32.totalorder %v416_v58, %v324_v50  ;;  %vm423_vm7 = vcmp.eq.s32.totalorder %v419_v61, %v324_v50 }
  0xcb   : > { %717 = vlog2.f32 %v391_v57  ;;  %v426_v62 = vsel %vm422_vm6, %v335_v29, 0.0  ;;  %v427_v3 = vsel %vm423_vm7, %v336_v32, 0.0 }
  0xcc   : > { %v431_v1 = vsel %vm325_vm3, %v426_v62, 0.0  ;;  %v433_v6 = vsel %vm325_vm3, %v427_v3, 0.0 }
  0xcd   : > { %v432_v4 = vadd.f32 %v431_v1, %v430_v2 }
  0xcf   : > { %v434_v7 = vadd.f32 %v433_v6, %v432_v4 }
  0xd5   : > { %v718_v5 = vpop.eup %717 }
  0xd6   : > { %v436_v8 = vmul.f32 0.6931472, %v718_v5 }
  0xd8   : > { %v437_v9 = vsub.f32 %v436_v8, %v434_v7 }
  0xda   : > { %v438_v11 = vsel %vm1057_vm2, %v437_v9, 0.0 }
  0xdb   : > { %v443_v12 = vadd.f32 %v441_v10, %v438_v11 }
  0xdd   : > { %444 = vst [vmem:[%s1063_s27] sm:$0x3] %v443_v12 }
  0xde   : > { %790 = shalt.err (!%p787_p12)
}
  0xdf   : > { %s791_s29 = scalar_lea.hbm %s1120_s24, 32  ;;  %s795_s10 = scalar_lea.hbm %s1174_s4, 64 }
  0xe0   : > { %p792_p1 = scmp.ne.s32.totalorder %s1120_s24, %s791_s29  ;;  %p796_p8 = scmp.lt.u32.totalorder %s1120_s24, %s1174_s4 }
  0xe1   : > { %p797_p0 = scmp.lt.u32.totalorder %s795_s10, %s791_s29  ;;  %p799_p13 = scmp.lt.u32.totalorder %s791_s29, %s1120_s24 }
  0xe2   : > { %p793_p3 = pnand %p792_p1, %p1185_p11 }
  0xe3   : > { %p798_p6 = por %p797_p0, %p796_p8 }
  0xe4   : > { %p794_p9 = pneg %p793_p3 }
  0xe5   : > { %p800_p2 = por %p799_p13, %p798_p6 }
  0xe7   : > { %p801_p5 = pnand %p800_p2, %p794_p9 }
  0xe9   : > { %804 = shalt.err (!%p801_p5)
}
  0xea   : > { %638 = dma.vmem_to_hbm [thread:$0]  (%p1185_p11), %s1122_s11, 32, %s1120_s24, %s450_s9  }
  0xeb PF: > { %s493_s30 = sand.u32 1, %s843_s18   ;;  %p1186_p4 = scmp.ne.s32.totalorder %s1180_s8, 0 }
  0xec   : > { %p1187_p7 = scmp.ge.s32.totalorder %s863_s23, 2  ;;  %s494_s16 = scalar_lea.sflag [#allocation4], %s493_s30 }
  0xee   : > { %p647_p10 = pnand %p1187_p7, %p1186_p4 }
  0xf0   : > { %834 = dma.done.wait (!%p647_p10), %s494_s16, 32  }
  0xf1   : > { %836 = vsyncadd (!%p647_p10), %s494_s16, 4294967264  ;;  %s503_s17 = scalar_lea.sflag [#allocation7], %s493_s30 }
  0xf2   : > { %838 = dma.done.wait (!%p647_p10), %s503_s17, 32  }
  0xf3   : > { %840 = vsyncadd (!%p647_p10), %s503_s17, 4294967264  ;;  %s25_s23 = sadd.s32 1, %s863_s23   ;;  %s1188_s18 = smov %s847_s19 }
  0xf4   : > { %p22_p12 = scmp.ge.s32.totalorder %s25_s23, 4   ;;  %s1189_s19 = smov %s851_s20 }
  0xf5   : > { %s1190_s20 = smov %s958_s7  ;;  %s1191_s21 = smov %s859_s22 }
  0xf6   : > { %s1192_s22 = smov %s1194_s26  ;;  %24 = sbr.rel (!%p22_p12) target bundleno = 8 (0x8), region = 105 }
  0xfd   :  { %508 = vsyncpa [#allocation3], 1 }
  0xfe   :  { %510 = vsyncpa [#allocation3 + $0x1], 1 }
  0xff   :  { %511 = vsyncpa [#allocation4], 1 }
 0x100   :  { %513 = vsyncpa [#allocation4 + $0x1], 1 }
 0x101   :  { %514 = vsyncpa [#allocation7], 1 }
 0x102   :  { %516 = vsyncpa [#allocation7 + $0x1], 1 }

</bundles_post_ra>
